<compile_context>
chip_gen: v7x
topology: tpu7x:2x2x1
jax: 0.10.0
libtpu: 0.0.40
codegen_flags: <defaults>
</compile_context>

<pallas_src>
import math
from functools import partial

import jax
import jax.numpy as jnp
from jax import lax
from jax.experimental import pallas as pl
from jax.experimental.pallas import tpu as pltpu

# Murmur3-style finalizer constants.
_K1 = 0x9E3779B1
_K2 = 0x85EBCA77
_M1 = 0x85EBCA6B
_M2 = 0xC2B2AE35


def _encoding_kernel(seed_ref, x_ref, pos_ref, o_ref, *, n_batch, emb, tile_s,
                     pos_full, training, rate, n_split, use_hw_prng):
    """out = token_embedding + pos (broadcast over batch) with opt. dropout.

    x_ref  : (tile_s, B*E)  -- (S,B,E) rows flattened onto the lane axis
    pos_ref: (tile_s, E) per-step block, or (S, E) resident when pos_full
    o_ref  : (tile_s, B*E)
    """
    B, E = n_batch, emb

    if pos_full:
        row0 = pl.multiple_of(pl.program_id(0) * tile_s, tile_s)
        p = pos_ref[pl.ds(row0, tile_s), :]
    else:
        p = pos_ref[...]

    do_dropout = training and rate > 0.0

    if not do_dropout:
        # Pure streaming add; per-batch lane-aligned slices (no pos replication).
        for b in range(B):
            o_ref[:, b * E:(b + 1) * E] = x_ref[:, b * E:(b + 1) * E] + p
        return

    scale = jnp.float32(1.0 / (1.0 - rate))

    if use_hw_prng:
        # Hardware PRNG path (preferred on v7x where the hash becomes
        # VALU-bound).  Bits come from a separate unit -> nearly free.
        # NOTE: mask depends on tile_s (per-step seeding), unlike the hash.
        pltpu.prng_seed(seed_ref[0] + pl.program_id(0))
        thresh = jnp.uint32(min(int(round(rate * (1 << 32))), (1 << 32) - 1))
        for b in range(B):
            y = x_ref[:, b * E:(b + 1) * E] + p
            bits = pltpu.prng_random_bits((tile_s, E))
            if bits.dtype != jnp.uint32:
                bits = pltpu.bitcast(bits, jnp.uint32)
            keep = bits >= thresh
            o_ref[:, b * E:(b + 1) * E] = jnp.where(
                keep, y.astype(jnp.float32) * scale, 0.0).astype(o_ref.dtype)
        return

    # Stateless-hash dropout: deterministic per seed, tiling-invariant, and
    # interpret-mode compatible.  One 32-bit hash word covers n_split elements;
    # sub-threshold compare:  byte_k >= t  <=>  (h << (24-8k)) >= (t << 24)
    # as an unsigned 32-bit compare (no mask/and needed).
    bits_per = 32 // n_split
    Wn = E // n_split
    t_sub = min(int(round(rate * (1 << bits_per))), (1 << bits_per) - 1)
    thresh = jnp.uint32(t_sub << (32 - bits_per))

    rows = lax.broadcasted_iota(jnp.int32, (tile_s, Wn), 0).astype(jnp.uint32)
    cols = lax.broadcasted_iota(jnp.int32, (tile_s, Wn), 1).astype(jnp.uint32)
    words_per_row = jnp.uint32(B * Wn)
    # (local_row * B*Wn + col) * K1 -- computed once per tile, reused per batch.
    rc_k1 = (rows * words_per_row + cols) * jnp.uint32(_K1)

    # Scalar (sreg) parts of the hash input, hoisted off the vector path.
    row0_u = (pl.program_id(0) * tile_s).astype(jnp.uint32)
    seed_mix = seed_ref[0].astype(jnp.uint32) * jnp.uint32(_K2)
    base_row = row0_u * words_per_row

    for b in range(B):
        base_b = (base_row + jnp.uint32(b * Wn)) * jnp.uint32(_K1) + seed_mix
        h = rc_k1 + base_b
        h = (h ^ (h >> 16)) * jnp.uint32(_M1)
        h = (h ^ (h >> 13)) * jnp.uint32(_M2)
        h = h ^ (h >> 16)
        for k in range(n_split):
            sh = 32 - bits_per * (k + 1)
            hk = h if sh == 0 else (h << sh)
            keep = hk >= thresh
            lo = b * E + k * Wn
            y = x_ref[:, lo:lo + Wn] + p[:, k * Wn:(k + 1) * Wn]
            # Scale in f32 (avoids bf16 rounding bias on kept values).
            o_ref[:, lo:lo + Wn] = jnp.where(
                keep, y.astype(jnp.float32) * scale, 0.0).astype(o_ref.dtype)


def make_pos_embedding(emb_size, maxlen=5000, dtype=jnp.float32):
    # Mirrors the PyTorch __init__ buffer construction (without the size-1 axis).
    den = jnp.exp(
        -jnp.arange(0, emb_size, 2, dtype=jnp.float32) * math.log(10000.0) / emb_size
    )
    pos = jnp.arange(0, maxlen, dtype=jnp.float32)[:, None]
    pe = jnp.zeros((maxlen, emb_size), dtype=jnp.float32)
    pe = pe.at[:, 0::2].set(jnp.sin(pos * den))
    pe = pe.at[:, 1::2].set(jnp.cos(pos * den))
    return pe.astype(dtype)


def _device_kind():
    try:
        return jax.devices()[0].device_kind.lower()
    except Exception:
        return ""


def positional_encoding(token_embedding, pos_embedding, *, dropout_rate=0.1,
                        training=False, seed=0, tile_s=None,
                        use_hw_prng=False):
    S, B, E = token_embedding.shape
    maxlen = pos_embedding.shape[0]
    assert S <= maxlen, f"sequence length {S} exceeds pos-embedding maxlen {maxlen}"
    assert 0.0 <= dropout_rate < 1.0, "dropout rate must be in [0, 1)"

    dtype = token_embedding.dtype
    itemsize = jnp.dtype(dtype).itemsize
    pos = pos_embedding[:S].astype(dtype)          # (S, E), input dtype
    x2 = token_embedding.reshape(S, B * E)         # free reshape (row-major)

    kind = _device_kind()
    is_v7 = "v7" in kind
    # v5e/v6e: 128 MiB VMEM -> bigger blocks amortize the ~0.35us/step overhead.
    # v7x: 64 MiB physical / 32 MiB scoped -> stay at ~2 MiB blocks.
    target_bytes = (2 if is_v7 else 4) * 1024 * 1024
    vmem_limit = (32 if is_v7 else 64) * 1024 * 1024
    # v7x megacore: keep >= 4 grid steps per TensorCore so DMA stays overlapped.
    min_steps = 8 if is_v7 else 2

    # Sublane packing: 8 rows (f32) / 16 (bf16) / 32 (int8/fp8).
    sub = {1: 32, 2: 16}.get(itemsize, 8)

    row_bytes = B * E * itemsize
    if tile_s is None:
        t = max(sub, (target_bytes // row_bytes) // sub * sub)
        if S >= min_steps * sub:
            t = min(t, max(sub, ((S // min_steps) // sub) * sub))
        tile_s = min(t, S)
    tile_s = int(min(tile_s, S))
    if tile_s < S and tile_s % sub != 0:
        tile_s = min(S, max(sub, (tile_s // sub) * sub))

    grid = (pl.cdiv(S, tile_s),)

    # Keep the whole pos table resident across grid steps when small and the
    # tiling divides it (one DMA total instead of one per step).
    pos_full = (S % tile_s == 0) and (S * E * itemsize <= 4 * 1024 * 1024)

    n_split = 1
    if training and dropout_rate > 0.0 and not use_hw_prng:
        n_split = 4 if E % 4 == 0 else (2 if E % 2 == 0 else 1)

    kern = partial(_encoding_kernel, n_batch=B, emb=E, tile_s=tile_s,
                   pos_full=pos_full, training=bool(training),
                   rate=float(dropout_rate), n_split=n_split,
                   use_hw_prng=bool(use_hw_prng))
    seed_arr = jnp.array([int(seed)], dtype=jnp.int32)

    if pos_full:
        pos_spec = pl.BlockSpec((S, E), lambda i, seed_ref: (0, 0))
    else:
        pos_spec = pl.BlockSpec((tile_s, E), lambda i, seed_ref: (i, 0))

    out2 = pl.pallas_call(
        kern,
        out_shape=jax.ShapeDtypeStruct((S, B * E), dtype),
        grid_spec=pltpu.PrefetchScalarGridSpec(
            num_scalar_prefetch=1,
            grid=grid,
            in_specs=[
                pl.BlockSpec((tile_s, B * E), lambda i, seed_ref: (i, 0)),
                pos_spec,
            ],
            out_specs=pl.BlockSpec((tile_s, B * E), lambda i, seed_ref: (i, 0)),
        ),
        compiler_params=pltpu.CompilerParams(
            dimension_semantics=("parallel",),
            vmem_limit_bytes=vmem_limit,
        ),
    )(seed_arr, x2, pos)
    return out2.reshape(S, B, E)


if __name__ == "__main__":
    # Shapes consistent with the module's forward: (seq, batch, emb), emb=512.
    S, B, E = 8, 2, 512
    MAXLEN = 64
    key = jax.random.PRNGKey(0)
    x = jax.random.normal(key, (S, B, E), dtype=jnp.float32)

    pos_table = make_pos_embedding(E, maxlen=MAXLEN)
    ref = x + pos_table[:S][:, None, :]

    # Eval mode: dropout is identity (matches module.eval()).
    out = jax.block_until_ready(
        positional_encoding(x, pos_table, dropout_rate=0.1, training=False))
    assert out.shape == (S, B, E)
    assert jnp.allclose(out, ref, atol=1e-6), "eval-mode mismatch vs reference"

    # Training mode: inverted dropout (hash-based mask; use_hw_prng=True would
    # switch to the hardware PRNG path, recommended on v7x).
    rate = 0.1
    out_tr = jax.block_until_ready(
        positional_encoding(x, pos_table, dropout_rate=rate, training=True,
                            seed=123))
    assert out_tr.shape == (S, B, E)
    scale = 1.0 / (1.0 - rate)
    ref_scaled = ref * scale
    dropped = (out_tr == 0)
    frac = float(jnp.mean(dropped.astype(jnp.float32)))
    assert 0.01 < frac < 0.4, f"unexpected drop fraction {frac}"
    # Every kept element must equal the scaled reference.
    kept_ok = jnp.where(dropped, ref_scaled, out_tr)
    assert jnp.allclose(kept_ok, ref_scaled, atol=1e-4, rtol=1e-4), \
        "training-mode kept values mismatch"

    print("KERNEL_OK")
</pallas_src>

<mosaic_0001>
module attributes {stable_mosaic.version = 11 : i64} {
  func.func @_encoding_kernel(%arg0: i32, %arg1: memref<1xi32, #tpu.memory_space<smem>>, %arg2: memref<8x1024xf32, #tpu.memory_space<vmem>>, %arg3: memref<8x512xf32, #tpu.memory_space<vmem>>, %arg4: memref<8x1024xf32, #tpu.memory_space<vmem>>) attributes {dimension_semantics = [#tpu.dimension_semantics<parallel>], iteration_bounds = array<i64: 1>, scalar_prefetch = 1 : i64, scratch_operands = 0 : i64, tpu.core_type = #tpu.core_type<tc>, window_params = [{transform_indices = @transform_0, window_bounds = array<i64: 8, 1024>}, {pipeline_mode = #tpu.pipeline_mode<synchronous>, transform_indices = @transform_1, window_bounds = array<i64: 8, 512>}, {transform_indices = @transform_2, window_bounds = array<i64: 8, 1024>}]} {
    %c8_i32 = arith.constant 8 : i32
    %0 = arith.muli %arg0, %c8_i32 : i32
    %1 = tpu.assume_multiple %0, 8 : i32
    %2 = arith.index_cast %1 : i32 to index
    %c0 = arith.constant 0 : index
    %3 = vector.load %arg3[%2, %c0] : memref<8x512xf32, #tpu.memory_space<vmem>>, vector<8x512xf32>
    %c0_0 = arith.constant 0 : index
    %c0_1 = arith.constant 0 : index
    %4 = vector.load %arg2[%c0_0, %c0_1] : memref<8x1024xf32, #tpu.memory_space<vmem>>, vector<8x512xf32>
    %5 = arith.addf %4, %3 : vector<8x512xf32>
    %c0_2 = arith.constant 0 : index
    %c0_3 = arith.constant 0 : index
    %6 = vector.load %arg4[%c0_2, %c0_3] : memref<8x1024xf32, #tpu.memory_space<vmem>>, vector<8x512xf32>
    tpu.vector_store %arg4[%c0_2, %c0_3], %5 {strides = array<i32>} : memref<8x1024xf32, #tpu.memory_space<vmem>>, vector<8x512xf32>,
    %c0_4 = arith.constant 0 : index
    %c512 = arith.constant 512 : index
    %7 = vector.load %arg2[%c0_4, %c512] : memref<8x1024xf32, #tpu.memory_space<vmem>>, vector<8x512xf32>
    %8 = arith.addf %7, %3 : vector<8x512xf32>
    %c0_5 = arith.constant 0 : index
    %c512_6 = arith.constant 512 : index
    %9 = vector.load %arg4[%c0_5, %c512_6] : memref<8x1024xf32, #tpu.memory_space<vmem>>, vector<8x512xf32>
    tpu.vector_store %arg4[%c0_5, %c512_6], %8 {strides = array<i32>} : memref<8x1024xf32, #tpu.memory_space<vmem>>, vector<8x512xf32>,
    return
  }
  func.func @transform_0(%arg0: i32, %arg1: memref<1xi32, #tpu.memory_space<smem>>) -> (i32, i32) {
    %c0_i32 = arith.constant 0 : i32
    %c0_i32_0 = arith.constant 0 : i32
    return %arg0, %c0_i32 : i32, i32
  }
  func.func @transform_1(%arg0: i32, %arg1: memref<1xi32, #tpu.memory_space<smem>>) -> (i32, i32) {
    %c0_i32 = arith.constant 0 : i32
    %c0_i32_0 = arith.constant 0 : i32
    %c0_i32_1 = arith.constant 0 : i32
    return %c0_i32, %c0_i32_0 : i32, i32
  }
  func.func @transform_2(%arg0: i32, %arg1: memref<1xi32, #tpu.memory_space<smem>>) -> (i32, i32) {
    %c0_i32 = arith.constant 0 : i32
    %c0_i32_0 = arith.constant 0 : i32
    return %arg0, %c0_i32 : i32, i32
  }
}

</mosaic_0001>

<bundles_post_ra>
// kernel: tpu_custom_call.1
= control target key start
LH: loop header
LB: loop body
LE: loop exit
PB: predicated region body
PF: predicated region fallthrough
CT: control target
= control target key end

     0   :  { %9 = vsyncpa [#allocation5], 0  ;;  %s224_s0 = inlined_call_operand.<no memory space> [shape: s32[1], index: 0, kind: input, shape index: {}]   ;;  %s225_s1 = inlined_call_operand.hbm [shape: f32[8,1024], index: 1, kind: input, shape index: {}]   ;;  %s226_s2 = inlined_call_operand.hbm [shape: f32[8,512], index: 2, kind: input, shape index: {}]   ;;  %s227_s3 = inlined_call_operand.hbm [shape: f32[8,1024], index: 3, kind: output, shape index: {}]  }
   0x1   :  { %10 = vsyncpa [#allocation8], 0 }
   0x2   :  { %11 = vsyncpa [#allocation6], 0  ;;  %s165_s12 = smov [#allocation4]   ;;  %s166_s14 = smov [#allocation7]  }
   0x3   :  { %s18_s13 = sshll.u32 %s165_s12, 4  ;;  %s28_s15 = sshll.u32 %s166_s14, 4  ;;  %s19_s13 = int_to_ptr.vmem [resolvable:$true] %s18_s13  ;;  %s29_s15 = int_to_ptr.vmem [resolvable:$true] %s28_s15 }
   0x4   :  { %s93_s17 = scalar_lea.hbm %s225_s1, 1024 }
   0x5   :  { %p94_p0 = scmp.ne.s32.totalorder %s225_s1, %s93_s17  ;;  %p97_p1 = scmp.lt.u32.totalorder %s93_s17, %s225_s1 }
   0x7   :  { %p99_p2 = pnand %p97_p1, %p94_p0 }
   0x9   :  { %102 = shalt.err (!%p99_p2)
}
   0xa   :  { %s103_s22 = scalar_lea.vmem %s19_s13, 1024  ;;  %p108_p4 = scmp.lt.s32.totalorder %s19_s13, %s19_s13 }
   0xb   :  { %p104_p3 = scmp.ne.s32.totalorder %s19_s13, %s103_s22  ;;  %p109_p5 = scmp.lt.s32.totalorder %s103_s22, %s103_s22 }
   0xd   :  { %p110_p6 = por %p109_p5, %p108_p4 }
   0xf   :  { %p111_p7 = pnand %p110_p6, %p104_p3 }
  0x11   :  { %114 = shalt.err (!%p111_p7)
}
  0x12   :  { %21 = dma.hbm_to_vmem [thread:$0]  %s225_s1, 1024, %s19_s13, [#allocation5]  }
  0x13   :  { %s115_s27 = scalar_lea.hbm %s226_s2, 512 }
  0x14   :  { %p116_p8 = scmp.ne.s32.totalorder %s226_s2, %s115_s27  ;;  %p119_p9 = scmp.lt.u32.totalorder %s115_s27, %s226_s2 }
  0x16   :  { %p121_p10 = pnand %p119_p9, %p116_p8 }
  0x18   :  { %124 = shalt.err (!%p121_p10)
}
  0x19   :  { %s125_s5 = scalar_lea.vmem %s29_s15, 512  ;;  %p130_p12 = scmp.lt.s32.totalorder %s29_s15, %s29_s15 }
  0x1a   :  { %p126_p11 = scmp.ne.s32.totalorder %s29_s15, %s125_s5  ;;  %p131_p13 = scmp.lt.s32.totalorder %s125_s5, %s125_s5 }
  0x1c   :  { %p132_p0 = por %p131_p13, %p130_p12 }
  0x1e   :  { %p133_p1 = pnand %p132_p0, %p126_p11 }
  0x20   :  { %136 = shalt.err (!%p133_p1)
}
  0x21   :  { %31 = dma.hbm_to_vmem [thread:$0]  %s226_s2, 512, %s29_s15, [#allocation8]  }
  0x22   :  { %159 = dma.done.wait [#allocation5], 1024  }
  0x23   :  { %160 = vsyncadd [#allocation5], 4294966272 }
  0x24   :  { %161 = dma.done.wait [#allocation8], 512  }
  0x25   :  { %162 = vsyncadd [#allocation8], 4294966784  ;;  %v44_v0 = vld [vmem:[#allocation7] sm:$0xff]  ;;  %v45_v2 = vld [vmem:[#allocation7 + $0x8] sm:$0xff]  ;;  %s167_s7 = smov [#allocation9]  }
  0x26   :  { %v48_v1 = vld [vmem:[#allocation4] sm:$0xff]  ;;  %v49_v4 = vld [vmem:[#allocation4 + $0x8] sm:$0xff]  ;;  %v46_v5 = vld [vmem:[#allocation7 + $0x10] sm:$0xff]  ;;  %s78_s8 = sshll.u32 %s167_s7, 4  ;;  %s79_s8 = int_to_ptr.vmem [resolvable:$true] %s78_s8 }
  0x27   :  { %v52_v3 = vadd.f32 %v48_v1, %v44_v0  ;;  %v50_v6 = vld [vmem:[#allocation4 + $0x10] sm:$0xff]  ;;  %v53_v7 = vadd.f32 %v49_v4, %v45_v2  ;;  %v47_v9 = vld [vmem:[#allocation7 + $0x18] sm:$0xff]  ;;  %v60_v11 = vld [vmem:[#allocation4 + $0x20] sm:$0xff]  ;;  %s137_s2 = scalar_lea.vmem %s79_s8, 1024  ;;  %p142_p3 = scmp.lt.s32.totalorder %s79_s8, %s79_s8 }
  0x28   :  { %v54_v8 = vadd.f32 %v50_v6, %v46_v5  ;;  %v51_v10 = vld [vmem:[#allocation4 + $0x18] sm:$0xff]  ;;  %v64_v13 = vadd.f32 %v60_v11, %v44_v0  ;;  %v61_v14 = vld [vmem:[#allocation4 + $0x28] sm:$0xff]  ;;  %v62_v15 = vld [vmem:[#allocation4 + $0x30] sm:$0xff]  ;;  %p138_p2 = scmp.ne.s32.totalorder %s79_s8, %s137_s2  ;;  %p143_p4 = scmp.lt.s32.totalorder %s137_s2, %s137_s2 }
  0x29   :  { %56 = vst [vmem:[#allocation9] sm:$0xff] %v52_v3  ;;  %v55_v12 = vadd.f32 %v51_v10, %v47_v9  ;;  %v63_v16 = vld [vmem:[#allocation4 + $0x38] sm:$0xff]  ;;  %57 = vst [vmem:[#allocation9 + $0x8] sm:$0xff] %v53_v7  ;;  %v65_v17 = vadd.f32 %v61_v14, %v45_v2  ;;  %v66_v18 = vadd.f32 %v62_v15, %v46_v5 }
  0x2a   :  { %58 = vst [vmem:[#allocation9 + $0x10] sm:$0xff] %v54_v8  ;;  %v67_v19 = vadd.f32 %v63_v16, %v47_v9  ;;  %68 = vst [vmem:[#allocation9 + $0x20] sm:$0xff] %v64_v13  ;;  %p144_p5 = por %p143_p4, %p142_p3 }
  0x2b   :  { %59 = vst [vmem:[#allocation9 + $0x18] sm:$0xff] %v55_v12  ;;  %69 = vst [vmem:[#allocation9 + $0x28] sm:$0xff] %v65_v17 }
  0x2c   :  { %70 = vst [vmem:[#allocation9 + $0x30] sm:$0xff] %v66_v18  ;;  %71 = vst [vmem:[#allocation9 + $0x38] sm:$0xff] %v67_v19  ;;  %p145_p6 = pnand %p144_p5, %p138_p2 }
  0x2e   :  { %148 = shalt.err (!%p145_p6)
}
  0x2f   :  { %s149_s11 = scalar_lea.hbm %s227_s3, 1024 }
  0x30   :  { %p150_p7 = scmp.ne.s32.totalorder %s227_s3, %s149_s11  ;;  %p153_p8 = scmp.lt.u32.totalorder %s149_s11, %s227_s3 }
  0x32   :  { %p155_p9 = pnand %p153_p8, %p150_p7 }
  0x34   :  { %158 = shalt.err (!%p155_p9)
}
  0x35   :  { %81 = dma.vmem_to_hbm [thread:$0]  %s79_s8, 1024, %s227_s3, [#allocation6]  }
  0x36   :  { %163 = dma.done.wait [#allocation6], 1024  }
  0x37   :  { %164 = vsyncadd [#allocation6], 4294966272 }
  0x38   :  { %85 = vsyncpa [#allocation5], 1 }
  0x39   :  { %86 = vsyncpa [#allocation8], 1 }
  0x3a   :  { %87 = vsyncpa [#allocation6], 1 }

</bundles_post_ra>
